<compile_context>
chip_gen: v7x
topology: tpu7x:2x2x1
jax: 0.10.0
libtpu: 0.0.40
codegen_flags: <defaults>
</compile_context>

<pallas_src>
from functools import partial

import jax
import jax.numpy as jnp
from jax.experimental import pallas as pl
from jax.experimental.pallas import tpu as pltpu


def _attention_kernel(xq_ref, xkv_ref, wq_ref, wk_ref, wv_ref, wo_ref, bo_ref,
                      o_ref, out_all_ref, *, heads, dim_head):
    # xq_ref : (Bb, Nq,  DIM)  bf16  q-tile rows of this (batch, q-tile) block
    # xkv_ref: (Bb, Nkv, DIM)  bf16  full-sequence rows (K/V source)
    # wq_ref : (DIM, inner)    bf16  softmax scale pre-folded
    # wk_ref : (DIM, inner)    bf16
    # wv_ref : (DIM, inner)    bf16
    # wo_ref : (inner, DIM)    bf16
    # bo_ref : (1, DIM)        f32
    # o_ref  : (Bb, Nq, DIM)
    # out_all_ref: (Bb*Nq, inner) f32 VMEM scratch holding head-packed outputs
    Bb, Nq, DIM = xq_ref.shape
    Nkv = xkv_ref.shape[1]
    inner = heads * dim_head
    cdt = wq_ref.dtype                      # MXU input dtype (bfloat16)
    Mq, Mkv = Bb * Nq, Bb * Nkv

    # Leading-axis collapses are free (no relayout).
    xq = xq_ref[...].reshape(Mq, DIM)
    xkv = xkv_ref[...].reshape(Mkv, DIM)

    # Head-packed, lane-dense projections with f32 accumulation.
    q_all = jnp.dot(xq, wq_ref[...], preferred_element_type=jnp.float32)   # (Mq,  inner)
    k_all = jnp.dot(xkv, wk_ref[...], preferred_element_type=jnp.float32)  # (Mkv, inner)
    v_all = jnp.dot(xkv, wv_ref[...], preferred_element_type=jnp.float32)  # (Mkv, inner)

    q_all = q_all.reshape(Bb, Nq, inner).astype(cdt)
    k_all = k_all.reshape(Bb, Nkv, inner).astype(cdt)
    v_all = v_all.reshape(Bb, Nkv, inner).astype(cdt)

    # Per-head attention core (small static head count; each iteration's
    # result is flushed to the out_all scratch, bounding live ranges).
    # TODO(synk): flash-style inner KV loop with online softmax for long N.
    for h in range(heads):
        lo, hi = h * dim_head, (h + 1) * dim_head
        q = q_all[:, :, lo:hi]                                     # (Bb, Nq,  d)
        k = k_all[:, :, lo:hi]                                     # (Bb, Nkv, d)
        v = v_all[:, :, lo:hi]                                     # (Bb, Nkv, d)

        dots = jnp.einsum('bid,bjd->bij', q, k,
                          preferred_element_type=jnp.float32)      # (Bb, Nq, Nkv) f32
        dots = dots - jnp.max(dots, axis=-1, keepdims=True)        # stable softmax (f32)
        e = jnp.exp(dots)
        attn = e * pl.reciprocal(jnp.sum(e, axis=-1, keepdims=True), approx=True)

        out_h = jnp.einsum('bij,bjd->bid', attn.astype(cdt), v,
                           preferred_element_type=jnp.float32)     # (Bb, Nq, d) f32
        out_all_ref[:, lo:hi] = out_h.reshape(Mq, dim_head)

    # Single full-depth output projection (contraction depth = inner, not d).
    y = jnp.dot(out_all_ref[...].astype(cdt), wo_ref[...],
                preferred_element_type=jnp.float32)                # (Mq, DIM)
    y = y + bo_ref[...]                                            # broadcast bias
    o_ref[...] = y.reshape(Bb, Nq, DIM).astype(o_ref.dtype)


def _vmem_limit_bytes():
    # Generation-aware VMEM budget: ~75% of physical capacity, conservative
    # fallback (safe on v5e/v6e/v7x) if the query is unavailable.
    try:
        cap = getattr(pltpu.get_tpu_info(), "vmem_capacity_bytes", None)
        if cap:
            return min(int(0.75 * cap), 100 * 1024 * 1024)
    except Exception:
        pass
    return 32 * 1024 * 1024


def _pick_blocks(B, N):
    # q-tile: whole sequence when short, otherwise a divisor of N near 256.
    if N <= 512:
        block_q = N
    else:
        block_q = 256
        while block_q > 8 and N % block_q:
            block_q //= 2
        if N % block_q:
            block_q = N
    # batch block: ~512 rows per step amortizes the ~0.35us grid overhead.
    block_b = max(1, min(B, 512 // max(block_q, 1)))
    while B % block_b:
        block_b -= 1
    # keep >= 2 grid steps when possible so both v7x TensorCores get work.
    if (B // block_b) * (N // block_q) < 2 and B >= 2:
        block_b = max(1, B // 2)
        while B % block_b:
            block_b -= 1
    return block_b, block_q


def attention_forward(x, w_qkv, w_out, b_out, *, heads, dim_head,
                      block_b=None, block_q=None, compute_dtype=jnp.bfloat16):
    B, N, DIM = x.shape
    inner = heads * dim_head
    scale = dim_head ** (-0.5)

    # ---- one-time weight / activation prep (outside the kernel) ------------
    # Heads stay packed: wide (DIM, inner) projection weights, softmax scale
    # folded into W_q once; bf16 MXU inputs, f32 accumulation in-kernel.
    w_q = (w_qkv[:, :inner] * scale).astype(compute_dtype)         # (DIM, inner)
    w_k = w_qkv[:, inner:2 * inner].astype(compute_dtype)          # (DIM, inner)
    w_v = w_qkv[:, 2 * inner:].astype(compute_dtype)               # (DIM, inner)
    w_o = w_out.astype(compute_dtype)                              # (inner, DIM)
    b_o = b_out.reshape(1, DIM).astype(jnp.float32)
    x_c = x.astype(compute_dtype)                                  # halve x DMA

    # ---- blocking -----------------------------------------------------------
    auto_b, auto_q = _pick_blocks(B, N)
    block_b = auto_b if block_b is None else block_b
    block_q = auto_q if block_q is None else block_q
    assert B % block_b == 0 and N % block_q == 0
    grid = (B // block_b, N // block_q)

    kernel = partial(_attention_kernel, heads=heads, dim_head=dim_head)

    # NOTE: the weight blocks have constant index maps, so Pallas DMAs them
    # only once; the KV x-block index is constant along the (inner) q-tile
    # axis, so it is also fetched once per batch block.
    return pl.pallas_call(
        kernel,
        out_shape=jax.ShapeDtypeStruct((B, N, DIM), x.dtype),
        grid_spec=pltpu.PrefetchScalarGridSpec(
            num_scalar_prefetch=0,
            grid=grid,
            in_specs=[
                pl.BlockSpec((block_b, block_q, DIM), lambda b, q: (b, q, 0)),  # x (q rows)
                pl.BlockSpec((block_b, N, DIM), lambda b, q: (b, 0, 0)),        # x (kv rows)
                pl.BlockSpec((DIM, inner), lambda b, q: (0, 0)),                # W_q (scaled)
                pl.BlockSpec((DIM, inner), lambda b, q: (0, 0)),                # W_k
                pl.BlockSpec((DIM, inner), lambda b, q: (0, 0)),                # W_v
                pl.BlockSpec((inner, DIM), lambda b, q: (0, 0)),                # W_out
                pl.BlockSpec((1, DIM), lambda b, q: (0, 0)),                    # b_out
            ],
            out_specs=pl.BlockSpec((block_b, block_q, DIM), lambda b, q: (b, q, 0)),
            scratch_shapes=[pltpu.VMEM((block_b * block_q, inner), jnp.float32)],
        ),
        compiler_params=pltpu.CompilerParams(
            dimension_semantics=("parallel", "parallel"),
            vmem_limit_bytes=_vmem_limit_bytes(),
        ),
    )(x_c, x_c, w_q, w_k, w_v, w_o, b_o)


def attention_reference(x, w_qkv, w_out, b_out, *, heads, dim_head):
    """Pure-JAX f32 reference mirroring the PyTorch forward."""
    B, N, DIM = x.shape
    inner = heads * dim_head
    scale = dim_head ** (-0.5)
    qkv = x @ w_qkv                                       # (B, N, 3*inner)
    q, k, v = jnp.split(qkv, 3, axis=-1)

    def to_heads(t):                                      # 'b n (h d) -> b h n d'
        return t.reshape(B, N, heads, dim_head).transpose(0, 2, 1, 3)

    q, k, v = map(to_heads, (q, k, v))
    dots = jnp.einsum('bhid,bhjd->bhij', q, k) * scale
    attn = jax.nn.softmax(dots, axis=-1)
    out = jnp.einsum('bhij,bhjd->bhid', attn, v)
    out = out.transpose(0, 2, 1, 3).reshape(B, N, inner)  # 'b h n d -> b n (h d)'
    return out @ w_out + b_out


if __name__ == "__main__":
    # Small shapes consistent with the module.
    B, N, DIM = 2, 8, 32
    HEADS, DIM_HEAD = 4, 16
    INNER = HEADS * DIM_HEAD

    key = jax.random.PRNGKey(0)
    k_x, k_qkv, k_out_w, k_out_b = jax.random.split(key, 4)

    x = jax.random.normal(k_x, (B, N, DIM), dtype=jnp.float32)

    # Deterministic parameter init (PyTorch-Linear-style uniform bounds),
    # stored as (in_features, out_features) for x @ W.
    bound_qkv = 1.0 / (DIM ** 0.5)
    w_qkv = jax.random.uniform(k_qkv, (DIM, 3 * INNER), jnp.float32,
                               minval=-bound_qkv, maxval=bound_qkv)
    bound_out = 1.0 / (INNER ** 0.5)
    w_out = jax.random.uniform(k_out_w, (INNER, DIM), jnp.float32,
                               minval=-bound_out, maxval=bound_out)
    b_out = jax.random.uniform(k_out_b, (DIM,), jnp.float32,
                               minval=-bound_out, maxval=bound_out)

    y = attention_forward(x, w_qkv, w_out, b_out, heads=HEADS, dim_head=DIM_HEAD)
    y = jax.block_until_ready(y)

    y_ref = attention_reference(x, w_qkv, w_out, b_out, heads=HEADS, dim_head=DIM_HEAD)
    assert y.shape == (B, N, DIM)
    # bf16 MXU inputs -> compare against the f32 reference with loosened tolerance.
    assert jnp.allclose(y, y_ref, atol=2e-2, rtol=2e-2), "Pallas output mismatch vs reference"

    print("KERNEL_OK")
</pallas_src>

<mosaic_0001>
module attributes {stable_mosaic.version = 11 : i64} {
  func.func @_attention_kernel(%arg0: i32, %arg1: i32, %arg2: memref<1x8x32xbf16, #tpu.memory_space<vmem>>, %arg3: memref<1x8x32xbf16, #tpu.memory_space<vmem>>, %arg4: memref<32x64xbf16, #tpu.memory_space<vmem>>, %arg5: memref<32x64xbf16, #tpu.memory_space<vmem>>, %arg6: memref<32x64xbf16, #tpu.memory_space<vmem>>, %arg7: memref<64x32xbf16, #tpu.memory_space<vmem>>, %arg8: memref<1x32xf32, #tpu.memory_space<vmem>>, %arg9: memref<1x8x32xf32, #tpu.memory_space<vmem>>, %arg10: memref<8x64xf32, #tpu.memory_space<vmem>>) attributes {dimension_semantics = [#tpu.dimension_semantics<parallel>, #tpu.dimension_semantics<parallel>], iteration_bounds = array<i64: 2, 1>, scalar_prefetch = 0 : i64, scratch_operands = 1 : i64, tpu.core_type = #tpu.core_type<tc>, window_params = [{transform_indices = @transform_0, window_bounds = array<i64: 1, 8, 32>}, {transform_indices = @transform_1, window_bounds = array<i64: 1, 8, 32>}, {pipeline_mode = #tpu.pipeline_mode<synchronous>, transform_indices = @transform_2, window_bounds = array<i64: 32, 64>}, {pipeline_mode = #tpu.pipeline_mode<synchronous>, transform_indices = @transform_3, window_bounds = array<i64: 32, 64>}, {pipeline_mode = #tpu.pipeline_mode<synchronous>, transform_indices = @transform_4, window_bounds = array<i64: 32, 64>}, {pipeline_mode = #tpu.pipeline_mode<synchronous>, transform_indices = @transform_5, window_bounds = array<i64: 64, 32>}, {pipeline_mode = #tpu.pipeline_mode<synchronous>, transform_indices = @transform_6, window_bounds = array<i64: 1, 32>}, {transform_indices = @transform_7, window_bounds = array<i64: 1, 8, 32>}]} {
    %c0 = arith.constant 0 : index
    %c0_0 = arith.constant 0 : index
    %c0_1 = arith.constant 0 : index
    %0 = vector.load %arg2[%c0, %c0_0, %c0_1] : memref<1x8x32xbf16, #tpu.memory_space<vmem>>, vector<1x8x32xbf16>
    %1 = vector.shape_cast %0 : vector<1x8x32xbf16> to vector<8x32xbf16>
    %c0_2 = arith.constant 0 : index
    %c0_3 = arith.constant 0 : index
    %c0_4 = arith.constant 0 : index
    %2 = vector.load %arg3[%c0_2, %c0_3, %c0_4] : memref<1x8x32xbf16, #tpu.memory_space<vmem>>, vector<1x8x32xbf16>
    %3 = vector.shape_cast %2 : vector<1x8x32xbf16> to vector<8x32xbf16>
    %c0_5 = arith.constant 0 : index
    %c0_6 = arith.constant 0 : index
    %4 = vector.load %arg4[%c0_5, %c0_6] : memref<32x64xbf16, #tpu.memory_space<vmem>>, vector<32x64xbf16>
    %cst = arith.constant dense<0.000000e+00> : vector<8x64xf32>
    %5 = tpu.matmul %1, %4, %cst {dimension_numbers = #tpu.dot_dimension_numbers<[1], [0], [0], [1], [0, 0, 1, 1], [], []>} : vector<8x32xbf16>, vector<32x64xbf16>, vector<8x64xf32> -> vector<8x64xf32>
    %c0_7 = arith.constant 0 : index
    %c0_8 = arith.constant 0 : index
    %6 = vector.load %arg5[%c0_7, %c0_8] : memref<32x64xbf16, #tpu.memory_space<vmem>>, vector<32x64xbf16>
    %cst_9 = arith.constant dense<0.000000e+00> : vector<8x64xf32>
    %7 = tpu.matmul %3, %6, %cst_9 {dimension_numbers = #tpu.dot_dimension_numbers<[1], [0], [0], [1], [0, 0, 1, 1], [], []>} : vector<8x32xbf16>, vector<32x64xbf16>, vector<8x64xf32> -> vector<8x64xf32>
    %c0_10 = arith.constant 0 : index
    %c0_11 = arith.constant 0 : index
    %8 = vector.load %arg6[%c0_10, %c0_11] : memref<32x64xbf16, #tpu.memory_space<vmem>>, vector<32x64xbf16>
    %cst_12 = arith.constant dense<0.000000e+00> : vector<8x64xf32>
    %9 = tpu.matmul %3, %8, %cst_12 {dimension_numbers = #tpu.dot_dimension_numbers<[1], [0], [0], [1], [0, 0, 1, 1], [], []>} : vector<8x32xbf16>, vector<32x64xbf16>, vector<8x64xf32> -> vector<8x64xf32>
    %10 = vector.shape_cast %5 : vector<8x64xf32> to vector<1x8x64xf32>
    %11 = arith.truncf %10 : vector<1x8x64xf32> to vector<1x8x64xbf16>
    %12 = vector.shape_cast %7 : vector<8x64xf32> to vector<1x8x64xf32>
    %13 = arith.truncf %12 : vector<1x8x64xf32> to vector<1x8x64xbf16>
    %14 = vector.shape_cast %9 : vector<8x64xf32> to vector<1x8x64xf32>
    %15 = arith.truncf %14 : vector<1x8x64xf32> to vector<1x8x64xbf16>
    %16 = vector.extract_strided_slice %11 {offsets = [0, 0, 0], sizes = [1, 8, 16], strides = [1, 1, 1]} : vector<1x8x64xbf16> to vector<1x8x16xbf16>
    %17 = vector.extract_strided_slice %13 {offsets = [0, 0, 0], sizes = [1, 8, 16], strides = [1, 1, 1]} : vector<1x8x64xbf16> to vector<1x8x16xbf16>
    %18 = vector.extract_strided_slice %15 {offsets = [0, 0, 0], sizes = [1, 8, 16], strides = [1, 1, 1]} : vector<1x8x64xbf16> to vector<1x8x16xbf16>
    "tpu.trace_start"() <{level = 10 : i32, message = "bid,bjd->bij"}> : () -> ()
    %cst_13 = arith.constant dense<0.000000e+00> : vector<1x8x8xf32>
    %19 = tpu.matmul %16, %17, %cst_13 {dimension_numbers = #tpu.dot_dimension_numbers<[2], [2], [1], [1], [0, 0, 0, 1, 1, 1], [0], [0]>} : vector<1x8x16xbf16>, vector<1x8x16xbf16>, vector<1x8x8xf32> -> vector<1x8x8xf32>
    "tpu.trace_stop"() : () -> ()
    %cst_14 = arith.constant dense<0xFF800000> : vector<1x8xf32>
    %20 = vector.multi_reduction <maximumf>, %19, %cst_14 [2] : vector<1x8x8xf32> to vector<1x8xf32>
    %21 = vector.shape_cast %20 : vector<1x8xf32> to vector<1x8x1xf32>
    %22 = vector.broadcast %21 : vector<1x8x1xf32> to vector<1x8x8xf32>
    %23 = arith.subf %19, %22 : vector<1x8x8xf32>
    %24 = math.exp %23 : vector<1x8x8xf32>
    %cst_15 = arith.constant dense<0.000000e+00> : vector<1x8xf32>
    %25 = vector.multi_reduction <add>, %24, %cst_15 [2] : vector<1x8x8xf32> to vector<1x8xf32>
    %26 = vector.shape_cast %25 : vector<1x8xf32> to vector<1x8x1xf32>
    %27 = tpu.reciprocal %26 {approx = true} : vector<1x8x1xf32> -> vector<1x8x1xf32>
    %28 = vector.broadcast %27 : vector<1x8x1xf32> to vector<1x8x8xf32>
    %29 = arith.mulf %24, %28 : vector<1x8x8xf32>
    %30 = arith.truncf %29 : vector<1x8x8xf32> to vector<1x8x8xbf16>
    "tpu.trace_start"() <{level = 10 : i32, message = "bij,bjd->bid"}> : () -> ()
    %cst_16 = arith.constant dense<0.000000e+00> : vector<1x8x16xf32>
    %31 = tpu.matmul %30, %18, %cst_16 {dimension_numbers = #tpu.dot_dimension_numbers<[2], [1], [1], [2], [0, 0, 0, 1, 1, 2], [0], [0]>} : vector<1x8x8xbf16>, vector<1x8x16xbf16>, vector<1x8x16xf32> -> vector<1x8x16xf32>
    "tpu.trace_stop"() : () -> ()
    %32 = vector.shape_cast %31 : vector<1x8x16xf32> to vector<8x16xf32>
    %c0_17 = arith.constant 0 : index
    %c0_18 = arith.constant 0 : index
    %33 = vector.load %arg10[%c0_17, %c0_18] : memref<8x64xf32, #tpu.memory_space<vmem>>, vector<8x16xf32>
    tpu.vector_store %arg10[%c0_17, %c0_18], %32 {strides = array<i32>} : memref<8x64xf32, #tpu.memory_space<vmem>>, vector<8x16xf32>,
    %34 = vector.extract_strided_slice %11 {offsets = [0, 0, 16], sizes = [1, 8, 16], strides = [1, 1, 1]} : vector<1x8x64xbf16> to vector<1x8x16xbf16>
    %35 = vector.extract_strided_slice %13 {offsets = [0, 0, 16], sizes = [1, 8, 16], strides = [1, 1, 1]} : vector<1x8x64xbf16> to vector<1x8x16xbf16>
    %36 = vector.extract_strided_slice %15 {offsets = [0, 0, 16], sizes = [1, 8, 16], strides = [1, 1, 1]} : vector<1x8x64xbf16> to vector<1x8x16xbf16>
    "tpu.trace_start"() <{level = 10 : i32, message = "bid,bjd->bij"}> : () -> ()
    %cst_19 = arith.constant dense<0.000000e+00> : vector<1x8x8xf32>
    %37 = tpu.matmul %34, %35, %cst_19 {dimension_numbers = #tpu.dot_dimension_numbers<[2], [2], [1], [1], [0, 0, 0, 1, 1, 1], [0], [0]>} : vector<1x8x16xbf16>, vector<1x8x16xbf16>, vector<1x8x8xf32> -> vector<1x8x8xf32>
    "tpu.trace_stop"() : () -> ()
    %cst_20 = arith.constant dense<0xFF800000> : vector<1x8xf32>
    %38 = vector.multi_reduction <maximumf>, %37, %cst_20 [2] : vector<1x8x8xf32> to vector<1x8xf32>
    %39 = vector.shape_cast %38 : vector<1x8xf32> to vector<1x8x1xf32>
    %40 = vector.broadcast %39 : vector<1x8x1xf32> to vector<1x8x8xf32>
    %41 = arith.subf %37, %40 : vector<1x8x8xf32>
    %42 = math.exp %41 : vector<1x8x8xf32>
    %cst_21 = arith.constant dense<0.000000e+00> : vector<1x8xf32>
    %43 = vector.multi_reduction <add>, %42, %cst_21 [2] : vector<1x8x8xf32> to vector<1x8xf32>
    %44 = vector.shape_cast %43 : vector<1x8xf32> to vector<1x8x1xf32>
    %45 = tpu.reciprocal %44 {approx = true} : vector<1x8x1xf32> -> vector<1x8x1xf32>
    %46 = vector.broadcast %45 : vector<1x8x1xf32> to vector<1x8x8xf32>
    %47 = arith.mulf %42, %46 : vector<1x8x8xf32>
    %48 = arith.truncf %47 : vector<1x8x8xf32> to vector<1x8x8xbf16>
    "tpu.trace_start"() <{level = 10 : i32, message = "bij,bjd->bid"}> : () -> ()
    %cst_22 = arith.constant dense<0.000000e+00> : vector<1x8x16xf32>
    %49 = tpu.matmul %48, %36, %cst_22 {dimension_numbers = #tpu.dot_dimension_numbers<[2], [1], [1], [2], [0, 0, 0, 1, 1, 2], [0], [0]>} : vector<1x8x8xbf16>, vector<1x8x16xbf16>, vector<1x8x16xf32> -> vector<1x8x16xf32>
    "tpu.trace_stop"() : () -> ()
    %50 = vector.shape_cast %49 : vector<1x8x16xf32> to vector<8x16xf32>
    %c0_23 = arith.constant 0 : index
    %c16 = arith.constant 16 : index
    %51 = vector.load %arg10[%c0_23, %c16] : memref<8x64xf32, #tpu.memory_space<vmem>>, vector<8x16xf32>
    tpu.vector_store %arg10[%c0_23, %c16], %50 {strides = array<i32>} : memref<8x64xf32, #tpu.memory_space<vmem>>, vector<8x16xf32>,
    %52 = vector.extract_strided_slice %11 {offsets = [0, 0, 32], sizes = [1, 8, 16], strides = [1, 1, 1]} : vector<1x8x64xbf16> to vector<1x8x16xbf16>
    %53 = vector.extract_strided_slice %13 {offsets = [0, 0, 32], sizes = [1, 8, 16], strides = [1, 1, 1]} : vector<1x8x64xbf16> to vector<1x8x16xbf16>
    %54 = vector.extract_strided_slice %15 {offsets = [0, 0, 32], sizes = [1, 8, 16], strides = [1, 1, 1]} : vector<1x8x64xbf16> to vector<1x8x16xbf16>
    "tpu.trace_start"() <{level = 10 : i32, message = "bid,bjd->bij"}> : () -> ()
    %cst_24 = arith.constant dense<0.000000e+00> : vector<1x8x8xf32>
    %55 = tpu.matmul %52, %53, %cst_24 {dimension_numbers = #tpu.dot_dimension_numbers<[2], [2], [1], [1], [0, 0, 0, 1, 1, 1], [0], [0]>} : vector<1x8x16xbf16>, vector<1x8x16xbf16>, vector<1x8x8xf32> -> vector<1x8x8xf32>
    "tpu.trace_stop"() : () -> ()
    %cst_25 = arith.constant dense<0xFF800000> : vector<1x8xf32>
    %56 = vector.multi_reduction <maximumf>, %55, %cst_25 [2] : vector<1x8x8xf32> to vector<1x8xf32>
    %57 = vector.shape_cast %56 : vector<1x8xf32> to vector<1x8x1xf32>
    %58 = vector.broadcast %57 : vector<1x8x1xf32> to vector<1x8x8xf32>
    %59 = arith.subf %55, %58 : vector<1x8x8xf32>
    %60 = math.exp %59 : vector<1x8x8xf32>
    %cst_26 = arith.constant dense<0.000000e+00> : vector<1x8xf32>
    %61 = vector.multi_reduction <add>, %60, %cst_26 [2] : vector<1x8x8xf32> to vector<1x8xf32>
    %62 = vector.shape_cast %61 : vector<1x8xf32> to vector<1x8x1xf32>
    %63 = tpu.reciprocal %62 {approx = true} : vector<1x8x1xf32> -> vector<1x8x1xf32>
    %64 = vector.broadcast %63 : vector<1x8x1xf32> to vector<1x8x8xf32>
    %65 = arith.mulf %60, %64 : vector<1x8x8xf32>
    %66 = arith.truncf %65 : vector<1x8x8xf32> to vector<1x8x8xbf16>
    "tpu.trace_start"() <{level = 10 : i32, message = "bij,bjd->bid"}> : () -> ()
    %cst_27 = arith.constant dense<0.000000e+00> : vector<1x8x16xf32>
    %67 = tpu.matmul %66, %54, %cst_27 {dimension_numbers = #tpu.dot_dimension_numbers<[2], [1], [1], [2], [0, 0, 0, 1, 1, 2], [0], [0]>} : vector<1x8x8xbf16>, vector<1x8x16xbf16>, vector<1x8x16xf32> -> vector<1x8x16xf32>
    "tpu.trace_stop"() : () -> ()
    %68 = vector.shape_cast %67 : vector<1x8x16xf32> to vector<8x16xf32>
    %c0_28 = arith.constant 0 : index
    %c32 = arith.constant 32 : index
    %69 = vector.load %arg10[%c0_28, %c32] : memref<8x64xf32, #tpu.memory_space<vmem>>, vector<8x16xf32>
    tpu.vector_store %arg10[%c0_28, %c32], %68 {strides = array<i32>} : memref<8x64xf32, #tpu.memory_space<vmem>>, vector<8x16xf32>,
    %70 = vector.extract_strided_slice %11 {offsets = [0, 0, 48], sizes = [1, 8, 16], strides = [1, 1, 1]} : vector<1x8x64xbf16> to vector<1x8x16xbf16>
    %71 = vector.extract_strided_slice %13 {offsets = [0, 0, 48], sizes = [1, 8, 16], strides = [1, 1, 1]} : vector<1x8x64xbf16> to vector<1x8x16xbf16>
    %72 = vector.extract_strided_slice %15 {offsets = [0, 0, 48], sizes = [1, 8, 16], strides = [1, 1, 1]} : vector<1x8x64xbf16> to vector<1x8x16xbf16>
    "tpu.trace_start"() <{level = 10 : i32, message = "bid,bjd->bij"}> : () -> ()
    %cst_29 = arith.constant dense<0.000000e+00> : vector<1x8x8xf32>
    %73 = tpu.matmul %70, %71, %cst_29 {dimension_numbers = #tpu.dot_dimension_numbers<[2], [2], [1], [1], [0, 0, 0, 1, 1, 1], [0], [0]>} : vector<1x8x16xbf16>, vector<1x8x16xbf16>, vector<1x8x8xf32> -> vector<1x8x8xf32>
    "tpu.trace_stop"() : () -> ()
    %cst_30 = arith.constant dense<0xFF800000> : vector<1x8xf32>
    %74 = vector.multi_reduction <maximumf>, %73, %cst_30 [2] : vector<1x8x8xf32> to vector<1x8xf32>
    %75 = vector.shape_cast %74 : vector<1x8xf32> to vector<1x8x1xf32>
    %76 = vector.broadcast %75 : vector<1x8x1xf32> to vector<1x8x8xf32>
    %77 = arith.subf %73, %76 : vector<1x8x8xf32>
    %78 = math.exp %77 : vector<1x8x8xf32>
    %cst_31 = arith.constant dense<0.000000e+00> : vector<1x8xf32>
    %79 = vector.multi_reduction <add>, %78, %cst_31 [2] : vector<1x8x8xf32> to vector<1x8xf32>
    %80 = vector.shape_cast %79 : vector<1x8xf32> to vector<1x8x1xf32>
    %81 = tpu.reciprocal %80 {approx = true} : vector<1x8x1xf32> -> vector<1x8x1xf32>
    %82 = vector.broadcast %81 : vector<1x8x1xf32> to vector<1x8x8xf32>
    %83 = arith.mulf %78, %82 : vector<1x8x8xf32>
    %84 = arith.truncf %83 : vector<1x8x8xf32> to vector<1x8x8xbf16>
    "tpu.trace_start"() <{level = 10 : i32, message = "bij,bjd->bid"}> : () -> ()
    %cst_32 = arith.constant dense<0.000000e+00> : vector<1x8x16xf32>
    %85 = tpu.matmul %84, %72, %cst_32 {dimension_numbers = #tpu.dot_dimension_numbers<[2], [1], [1], [2], [0, 0, 0, 1, 1, 2], [0], [0]>} : vector<1x8x8xbf16>, vector<1x8x16xbf16>, vector<1x8x16xf32> -> vector<1x8x16xf32>
    "tpu.trace_stop"() : () -> ()
    %86 = vector.shape_cast %85 : vector<1x8x16xf32> to vector<8x16xf32>
    %c0_33 = arith.constant 0 : index
    %c48 = arith.constant 48 : index
    %87 = vector.load %arg10[%c0_33, %c48] : memref<8x64xf32, #tpu.memory_space<vmem>>, vector<8x16xf32>
    tpu.vector_store %arg10[%c0_33, %c48], %86 {strides = array<i32>} : memref<8x64xf32, #tpu.memory_space<vmem>>, vector<8x16xf32>,
    %c0_34 = arith.constant 0 : index
    %c0_35 = arith.constant 0 : index
    %88 = vector.load %arg10[%c0_34, %c0_35] : memref<8x64xf32, #tpu.memory_space<vmem>>, vector<8x64xf32>
    %89 = arith.truncf %88 : vector<8x64xf32> to vector<8x64xbf16>
    %c0_36 = arith.constant 0 : index
    %c0_37 = arith.constant 0 : index
    %90 = vector.load %arg7[%c0_36, %c0_37] : memref<64x32xbf16, #tpu.memory_space<vmem>>, vector<64x32xbf16>
    %cst_38 = arith.constant dense<0.000000e+00> : vector<8x32xf32>
    %91 = tpu.matmul %89, %90, %cst_38 {dimension_numbers = #tpu.dot_dimension_numbers<[1], [0], [0], [1], [0, 0, 1, 1], [], []>} : vector<8x64xbf16>, vector<64x32xbf16>, vector<8x32xf32> -> vector<8x32xf32>
    %c0_39 = arith.constant 0 : index
    %c0_40 = arith.constant 0 : index
    %92 = vector.load %arg8[%c0_39, %c0_40] : memref<1x32xf32, #tpu.memory_space<vmem>>, vector<1x32xf32>
    %93 = vector.broadcast %92 : vector<1x32xf32> to vector<8x32xf32>
    %94 = arith.addf %91, %93 : vector<8x32xf32>
    %95 = vector.shape_cast %94 : vector<8x32xf32> to vector<1x8x32xf32>
    %c0_41 = arith.constant 0 : index
    %c0_42 = arith.constant 0 : index
    %c0_43 = arith.constant 0 : index
    %96 = vector.load %arg9[%c0_41, %c0_42, %c0_43] : memref<1x8x32xf32, #tpu.memory_space<vmem>>, vector<1x8x32xf32>
    tpu.vector_store %arg9[%c0_41, %c0_42, %c0_43], %95 {strides = array<i32>} : memref<1x8x32xf32, #tpu.memory_space<vmem>>, vector<1x8x32xf32>,
    return
  }
  func.func @transform_0(%arg0: i32, %arg1: i32) -> (i32, i32, i32) {
    %c0_i32 = arith.constant 0 : i32
    %c0_i32_0 = arith.constant 0 : i32
    return %arg0, %arg1, %c0_i32 : i32, i32, i32
  }
  func.func @transform_1(%arg0: i32, %arg1: i32) -> (i32, i32, i32) {
    %c0_i32 = arith.constant 0 : i32
    %c0_i32_0 = arith.constant 0 : i32
    %c0_i32_1 = arith.constant 0 : i32
    return %arg0, %c0_i32, %c0_i32_0 : i32, i32, i32
  }
  func.func @transform_2(%arg0: i32, %arg1: i32) -> (i32, i32) {
    %c0_i32 = arith.constant 0 : i32
    %c0_i32_0 = arith.constant 0 : i32
    %c0_i32_1 = arith.constant 0 : i32
    return %c0_i32, %c0_i32_0 : i32, i32
  }
  func.func @transform_3(%arg0: i32, %arg1: i32) -> (i32, i32) {
    %c0_i32 = arith.constant 0 : i32
    %c0_i32_0 = arith.constant 0 : i32
    %c0_i32_1 = arith.constant 0 : i32
    return %c0_i32, %c0_i32_0 : i32, i32
  }
  func.func @transform_4(%arg0: i32, %arg1: i32) -> (i32, i32) {
    %c0_i32 = arith.constant 0 : i32
    %c0_i32_0 = arith.constant 0 : i32
    %c0_i32_1 = arith.constant 0 : i32
    return %c0_i32, %c0_i32_0 : i32, i32
  }
  func.func @transform_5(%arg0: i32, %arg1: i32) -> (i32, i32) {
    %c0_i32 = arith.constant 0 : i32
    %c0_i32_0 = arith.constant 0 : i32
    %c0_i32_1 = arith.constant 0 : i32
    return %c0_i32, %c0_i32_0 : i32, i32
  }
  func.func @transform_6(%arg0: i32, %arg1: i32) -> (i32, i32) {
    %c0_i32 = arith.constant 0 : i32
    %c0_i32_0 = arith.constant 0 : i32
    %c0_i32_1 = arith.constant 0 : i32
    return %c0_i32, %c0_i32_0 : i32, i32
  }
  func.func @transform_7(%arg0: i32, %arg1: i32) -> (i32, i32, i32) {
    %c0_i32 = arith.constant 0 : i32
    %c0_i32_0 = arith.constant 0 : i32
    return %arg0, %arg1, %c0_i32 : i32, i32, i32
  }
}

</mosaic_0001>

<bundles_post_ra>
// kernel: tpu_custom_call.1
= control target key start
LH: loop header
LB: loop body
LE: loop exit
PB: predicated region body
PF: predicated region fallthrough
CT: control target
= control target key end

     0   :  { %s1979_s0 = inlined_call_operand.hbm [shape: bf16[2,8,32], index: 0, kind: input, shape index: {}]   ;;  %s1980_s1 = inlined_call_operand.hbm [shape: bf16[2,8,32], index: 1, kind: input, shape index: {}]   ;;  %s1981_s2 = inlined_call_operand.vmem [shape: bf16[32,64], index: 2, kind: input, shape index: {}]   ;;  %s1982_s3 = inlined_call_operand.vmem [shape: bf16[32,64], index: 3, kind: input, shape index: {}]   ;;  %s1983_s4 = inlined_call_operand.vmem [shape: bf16[32,64], index: 4, kind: input, shape index: {}]   ;;  %s1984_s5 = inlined_call_operand.vmem [shape: bf16[64,32], index: 5, kind: input, shape index: {}]   ;;  %s1985_s6 = inlined_call_operand.vmem [shape: f32[1,32], index: 6, kind: input, shape index: {}]   ;;  %s1986_s7 = inlined_call_operand.hbm [shape: f32[2,8,32], index: 7, kind: output, shape index: {}]  }
   0x1   :  { %1992 = sst [smem:[#allocation13_spill]] %s1979_s0 }
   0x2   :  { %12 = vsyncpa [#allocation4], 0 }
   0x3   :  { %14 = vsyncpa [#allocation4 + $0x1], 0 }
   0x4   :  { %15 = vsyncpa [#allocation7], 0 }
   0x5   :  { %17 = vsyncpa [#allocation7 + $0x1], 0 }
   0x6   :  { %18 = vsyncpa [#allocation5], 0 }
   0x7   :  { %20 = vsyncpa [#allocation5 + $0x1], 0  ;;  %s1645_s24 = smov 0   ;;  %s1647_s25 = smov 0  }
   0x8   :  { %s1649_s26 = smov 0   ;;  %s1651_s27 = smov 0  }
   0x9   :  { %s1653_s28 = smov 0   ;;  %s1655_s29 = smov 0  }
   0xa LB: > { %s1192_s30 = sadd.s32 4294967295, %s1592_s29   ;;  %s1193_s8 = sadd.s32 4294967294, %s1592_s29   ;;  %s1592_s29 = sphi %s1655_s29, %s26_s29   ;;  %s1588_s28 = sphi %s1653_s28, %s2015_s28   ;;  %s1584_s27 = sphi %s1651_s27, %s2014_s27   ;;  %s1580_s26 = sphi %s1649_s26, %s2013_s26   ;;  %s1576_s25 = sphi %s1647_s25, %s2012_s25   ;;  %s1572_s24 = sphi %s1645_s24, %s2011_s24  }
   0xb   : > { %s38_s9 = sadd.s32 1, %s1588_s28  ;;  %s47_s10 = sadd.s32 1, %s1580_s26 }
   0xc   : > { %p40_p0 = scmp.ge.s32.totalorder %s38_s9, 2  ;;  %p54_p1 = scmp.ne.s32.totalorder %s1580_s26, %s1576_s25 }
   0xd   : > { %p55_p2 = scmp.eq.s32.totalorder %s1592_s29, 0  ;;  %p60_p3 = scmp.ne.s32.totalorder %s1576_s25, %s1572_s24 }
   0xe   : > { %s2017_s9 = smov (%p40_p0, %s38_s9), 0  ;;  %p61_p5 = scmp.eq.s32.totalorder %s1192_s30, 0 }
   0xf   : > { %1993 = sst [smem:[#allocation12_spill]] %s2017_s9  ;;  %p1686_p4 = por %p55_p2, %p54_p1 }
  0x10   : > { %s42_s12 = ssub.s32 %s1588_s28, %s2017_s9  ;;  %p217_p6 = scmp.eq.s32.totalorder %s1192_s30, 1 }
  0x11   : > { %p45_p7 = scmp.eq.s32.totalorder %s42_s12, 0  ;;  %p1692_p8 = por %p61_p5, %p60_p3 }
  0x12   : > { %p1696_p9 = por %p217_p6, %p54_p1  ;;  %p223_p10 = scmp.eq.s32.totalorder %s1193_s8, 1 }
  0x13   : > { %s1995_s13 = scalar_select %p1692_p8, 1, 0 }
  0x14   : > { %s1996_s14 = scalar_select %p1696_p9, 1, 0 }
  0x15   : > { %s1701_s15 = scalar_select %p45_p7, %s1580_s26, %s47_s10  }
  0x16   : > { %p1703_p11 = por %p223_p10, %p60_p3  ;;  %p1362_p13 = scmp.lt.s32.totalorder %s1592_s29, 2 }
  0x17   : > { %s1710_s17 = sand.u32 1, %s1580_s26   ;;  %s1988_s19 = sshll.u32 %s1588_s28, 6 }
  0x18   : > { %s1997_s16 = scalar_select %p1703_p11, 1, 0 }
  0x19   : > { %s1987_s18 = sshll.u32 %s1710_s17, 2  ;;  %s1998_s0 = sld [smem:[#allocation13_spill]] }
  0x1a   : > { %s262_s23 = scalar_lea.vmem [#allocation3], %s1987_s18  ;;  %p1727_p0 = pnand %p1362_p13, %p1686_p4 }
  0x1b   : > { %s270_s30 = sshll.u32 %s262_s23, 4  ;;  %s259_s10 = scalar_lea.sflag [#allocation4], %s1710_s17  ;;  %s1723_s30 = int_to_ptr.vmem [resolvable:$true] %s270_s30 }
  0x1c   : > { %p1448_p5 = pneg %p1727_p0 }
  0x1f   : > { %s1719_s22 = scalar_lea.hbm %s1998_s0, %s1988_s19  ;;  %s1451_s11 = scalar_lea.hbm %s1998_s0, 128 }
  0x20   : > { %s1446_s12 = scalar_lea.hbm %s1719_s22, 64  ;;  %p1452_p4 = scmp.lt.u32.totalorder %s1719_s22, %s1998_s0 }
  0x21   : > { %p1447_p3 = scmp.ne.s32.totalorder %s1719_s22, %s1446_s12  ;;  %p1453_p10 = scmp.lt.u32.totalorder %s1451_s11, %s1446_s12 }
  0x22   : > { %p1455_p12 = scmp.lt.u32.totalorder %s1446_s12, %s1719_s22 }
  0x23   : > { %p1449_p6 = pnand %p1448_p5, %p1447_p3  ;;  %p1454_p13 = por %p1453_p10, %p1452_p4 }
  0x25   : > { %p1450_p7 = pneg %p1449_p6  ;;  %p1456_p1 = por %p1455_p12, %p1454_p13 }
  0x27   : > { %p1457_p2 = pnand %p1456_p1, %p1450_p7 }
  0x29   : > { %1460 = shalt.err (!%p1457_p2)
}
  0x2a   : > { %s1461_s19 = scalar_lea.vmem %s1723_s30, 64  ;;  %s1594_s20 = smov [#allocation3]  }
  0x2b   : > { %p1462_p3 = scmp.ne.s32.totalorder %s1723_s30, %s1461_s19  ;;  %s1466_s21 = sshll.u32 %s1594_s20, 4  ;;  %s1467_s21 = int_to_ptr.vmem [resolvable:$false] %s1466_s21 }
  0x2c   : > { %s1468_s18 = scalar_lea.vmem %s1467_s21, 128  ;;  %p1469_p9 = scmp.lt.s32.totalorder %s1723_s30, %s1467_s21 }
  0x2d   : > { %p1464_p6 = pnand %p1462_p3, %p1448_p5  ;;  %p1470_p4 = scmp.lt.s32.totalorder %s1468_s18, %s1461_s19 }
  0x2f   : > { %p1465_p11 = pneg %p1464_p6  ;;  %p1471_p10 = por %p1470_p4, %p1469_p9 }
  0x31   : > { %p1472_p12 = pnand %p1471_p10, %p1465_p11 }
  0x33   : > { %1475 = shalt.err (!%p1472_p12)
}
  0x34   : > { %1354 = dma.hbm_to_vmem [thread:$0]  (!%p1727_p0), %s1719_s22, 64, %s1723_s30, %s259_s10  }
  0x35   : > { %p2000_p1 = scmp.lt.s32.totalorder %s1592_s29, 3  ;;  %p2001_p2 = scmp.ge.s32.totalorder %s1592_s29, 1 }
  0x36   : > { %s2003_s19 = sshll.u32 %s1588_s28, 6  ;;  %s2004_s21 = sshll.u32 %s1710_s17, 2 }
  0x37   : > { %p1763_p7 = pnand %p2001_p2, %p2000_p1  ;;  %s1772_s20 = scalar_lea.hbm %s1980_s1, %s2003_s19 }
  0x38   : > { %s281_s18 = scalar_lea.vmem [#allocation6], %s2004_s21  ;;  %s278_s22 = scalar_lea.sflag [#allocation7], %s1710_s17 }
  0x39   : > { %s2002_s12 = scalar_select %p1763_p7, 1, 0 }
  0x3a   : > { %s288_s0 = sshll.u32 %s281_s18, 4  ;;  %s1476_s30 = scalar_lea.hbm %s1772_s20, 64  ;;  %s289_s0 = int_to_ptr.vmem [resolvable:$true] %s288_s0 }
  0x3b   : > { %p1477_p9 = scmp.ne.s32.totalorder %s1772_s20, %s1476_s30  ;;  %s1481_s19 = scalar_lea.hbm %s1980_s1, 128 }
  0x3c   : > { %p1482_p3 = scmp.lt.u32.totalorder %s1772_s20, %s1980_s1  ;;  %p1483_p6 = scmp.lt.u32.totalorder %s1481_s19, %s1476_s30 }
  0x3d   : > { %p1479_p11 = pnand %p1477_p9, %p1448_p5  ;;  %p1485_p10 = scmp.lt.u32.totalorder %s1476_s30, %s1772_s20 }
  0x3e   : > { %p1484_p4 = por %p1483_p6, %p1482_p3 }
  0x3f   : > { %p1480_p13 = pneg %p1479_p11 }
  0x40   : > { %p1486_p12 = por %p1485_p10, %p1484_p4 }
  0x42   : > { %p1487_p1 = pnand %p1486_p12, %p1480_p13 }
  0x44   : > { %1490 = shalt.err (!%p1487_p1)
}
  0x45   : > { %s1491_s17 = scalar_lea.vmem %s289_s0, 64  ;;  %s1595_s21 = smov [#allocation6]  }
  0x46   : > { %p1492_p2 = scmp.ne.s32.totalorder %s289_s0, %s1491_s17  ;;  %s1496_s9 = sshll.u32 %s1595_s21, 4  ;;  %s1497_s9 = int_to_ptr.vmem [resolvable:$false] %s1496_s9 }
  0x47   : > { %s1498_s18 = scalar_lea.vmem %s1497_s9, 128  ;;  %p1499_p8 = scmp.lt.s32.totalorder %s289_s0, %s1497_s9 }
  0x48   : > { %p1494_p9 = pnand %p1492_p2, %p1448_p5  ;;  %p1500_p7 = scmp.lt.s32.totalorder %s1498_s18, %s1491_s17 }
  0x4a   : > { %p1495_p11 = pneg %p1494_p9  ;;  %p1501_p3 = por %p1500_p7, %p1499_p8 }
  0x4c   : > { %p1502_p6 = pnand %p1501_p3, %p1495_p11 }
  0x4e   : > { %1505 = shalt.err (!%p1502_p6)
}
  0x4f   : > { %1357 = dma.hbm_to_vmem [thread:$0]  (!%p1727_p0), %s1772_s20, 64, %s289_s0, %s278_s22  }
  0x50   : > { %p2005_p13 = scmp.ne.s32.totalorder %s2002_s12, 0 }
  0x51   : > { %s1799_s30 = sand.u32 (!%p2005_p13), 1, %s1576_s25   ;;  %p2006_p5 = scmp.ne.s32.totalorder (!%p2005_p13), %s1995_s13, 0 }
  0x52   : > { %297 = sbr.rel (%p2005_p13) target bundleno = 1549 (0x60d), region = 48  ;;  %s1201_s10 = sshll.u32 (!%p2005_p13), %s1799_s30, 2 }
  0x53   : > { %s300_s19 = scalar_lea.sflag (!%p2005_p13), [#allocation4], %s1799_s30  ;;  %s303_s11 = scalar_lea.vmem (!%p2005_p13), [#allocation3], %s1201_s10 }
  0x59   : > { %1559 = dma.done.wait (%p2006_p5), %s300_s19, 64  }
  0x5a   : > { %1561 = vsyncadd (%p2006_p5), %s300_s19, 4294967232  ;;  %s309_s0 = scalar_lea.sflag [#allocation7], %s1799_s30  ;;  %s312_s8 = scalar_lea.vmem [#allocation6], %s1201_s10 }
  0x5b   : > { %1563 = dma.done.wait (%p2006_p5), %s309_s0, 64  }
  0x5c   : > { %1565 = vsyncadd (%p2006_p5), %s309_s0, 4294967232  ;;  %v1596_v0 = vmov 0.0   ;;  %vm1597_vm0 = vmmov 0   ;;  %v1420_v1 = vld [vmem:[%s1982_s3] sm:$0xff]   ;;  %v1422_v3 = vld [vmem:[%s1982_s3 + $0x8] sm:$0xff]   ;;  %vm367_vm1 = vcmask 261120  }
  0x5d   : > { %1269 = vmatprep.subr.bf16.mxu1 %v1596_v0  ;;  %1261 = vmatprep.subr.bf16.mxu0 %v1596_v0  ;;  %v1421_v2 = vld [vmem:[%s1981_s2] sm:$0xff]   ;;  %v350_v4 = vld [vmem:[%s312_s8] sm:$0xf]  ;;  %v1423_v5 = vld [vmem:[%s1981_s2 + $0x8] sm:$0xff]   ;;  %vm529_vm2 = vcmask 130048   ;;  %s1598_s18 = smov 96  }
  0x5e   : > { %1273 = vmatprep.mubr.msk.bf16.mxu1 %vm1597_vm0, %v1596_v0  ;;  %1265 = vmatprep.mubr.msk.bf16.mxu0 %vm1597_vm0, %v1596_v0  ;;  %v349_v6 = vld [vmem:[%s303_s11] sm:$0xf]  ;;  %s1599_s10 = smov 112   ;;  %s1600_s19 = smov 80   ;;  %v1424_v18 = vld [vmem:[%s1983_s4] sm:$0xff]   ;;  %vm576_vm3 = vcmask 64512  }
  0x5f   : > { %1270 = vmatpush3.bf16.msra.mxu1 %v1420_v1  ;;  %1262 = vmatpush3.bf16.msra.mxu0 %v1421_v2  ;;  %v1425_v19 = vld [vmem:[%s1983_s4 + $0x8] sm:$0xff]   ;;  %vm592_vm4 = vcmask 1043456   ;;  %s1601_s17 = smov 16   ;;  %s1603_s11 = smov 48   ;;  %vm754_vm5 = vcmask 261248   ;;  %vm870_vm6 = vcmask 392448  }
  0x60   : > { %1271 = vmatprep.subr.bf16.mxu1 %v1596_v0  ;;  %1263 = vmatprep.subr.bf16.mxu0 %v1596_v0  ;;  %vm986_vm7 = vcmask 523648   ;;  %vm1029_vm8 = vcmask 523264   ;;  %s1203_s0 = sshll.u32 %s1799_s30, 3  ;;  %s1228_s20 = sshll.u32 %s1584_s27, 7 }
  0x61   : > { %s347_s22 = scalar_lea.vmem [#allocation8], %s1203_s0  ;;  %s1929_s21 = scalar_lea.hbm %s1986_s7, %s1228_s20 }
  0x62   : > { %s1089_s23 = sshll.u32 %s347_s22, 4  ;;  %s1075_s27 = scalar_lea.sflag [#allocation5], %s1799_s30  ;;  %s1931_s23 = int_to_ptr.vmem [resolvable:$true] %s1089_s23 }
  0x63   : > { %1272 = vmatpush3.bf16.msra.mxu1 %v1422_v3  ;;  %1264 = vmatpush3.bf16.msra.mxu0 %v1423_v5  ;;  %s1506_s9 = scalar_lea.vmem %s1931_s23, 128  ;;  %p2007_p0 = scmp.ne.s32.totalorder %s1996_s14, 0 }
  0x64   : > { %1285 = vmatprep.subr.bf16.mxu1 %v1596_v0  ;;  %1277 = vmatprep.subr.bf16.mxu0 %v1596_v0  ;;  %p1507_p8 = scmp.ne.s32.totalorder %s1931_s23, %s1506_s9 }
  0x66   : > { %1274 = vmatmul.mubr.msk.bf16.vlgmr.msra.gmra.mrb[0].mxu1 %vm367_vm1, %v350_v4  ;;  %1266 = vmatmul.mubr.msk.bf16.vlgmr.msra.gmra.mrb[0].mxu0 %vm367_vm1, %v349_v6  ;;  %p1508_p7 = pnand %p1507_p8, %p2007_p0 }
  0x67   : > { %1287 = vmatprep.mubr.msk.bf16.mxu1 %vm1597_vm0, %v1596_v0  ;;  %1281 = vmatprep.mubr.msk.bf16.mxu0 %vm1597_vm0, %v1596_v0 }
  0x68   : > { %1278 = vmatpush3.bf16.msra.mxu0 %v1424_v18  ;;  %p1509_p4 = pneg %p1508_p7 }
  0x69   : > { %1279 = vmatprep.subr.bf16.mxu0 %v1596_v0 }
  0x6c   : > { %1280 = vmatpush3.bf16.msra.mxu0 %v1425_v19 }
  0x6d   : > { %1291 = vmatprep.subr.bf16.mxu0 %v1596_v0 }
  0x6f   : > { %1282 = vmatmul.mubr.msk.bf16.vlgmr.msra.gmra.mrb[4].mxu0 %vm367_vm1, %v350_v4 }
  0x70   : > { %1293 = vmatprep.mubr.msk.bf16.mxu0 %vm1597_vm0, %v1596_v0 }
 0x139   : > { %v464_v7 = vpop.f32.mrb[0].mxu1  ;;  %v405_v10 = vpop.f32.mrb[0].mxu0 }
 0x13a   : > { %v527_v8 = vpack.c.bf16 %v464_v7, %v464_v7  ;;  %v1275_v9 = vpop.f32.mrb[1].mxu1  ;;  %v1267_v12 = vpop.f32.mrb[1].mxu0  ;;  %v526_v14 = vpack.c.bf16 %v405_v10, %v405_v10 }
 0x13b   : > { %v467_v11 = vpop.f32.mrb[2].mxu1  ;;  %v408_v16 = vpop.f32.mrb[2].mxu0 }
 0x13c   : > { %758 = vrot.lane.b32.xlu1 %v527_v8, %s1598_s18  ;;  %641 = vrot.lane.b32.xlu0 %v527_v8, %s1599_s10  ;;  %v1276_v13 = vpop.f32.mrb[3].mxu1  ;;  %v534_v15 = vsel %vm529_vm2, %v527_v8, 0  ;;  %v1268_v17 = vpop.f32.mrb[3].mxu0 }
 0x13d   : > { %1286 = vmatpush3.bf16.xpose.msra.mxu1 %v534_v15 }
 0x13e   : > { %1297 = vmatprep.subr.bf16.mxu1 %v1596_v0 }
 0x140   : > { %756 = vrot.lane.b32.xlu1 %v526_v14, %s1598_s18  ;;  %638 = vrot.lane.b32.xlu0 %v526_v14, %s1599_s10 }
 0x142   : > { %v520_v34 = vpop.f32.mrb[4].mxu0 }
 0x143   : > { %v528_v35 = vpack.c.bf16 %v520_v34, %v520_v34  ;;  %v1283_v36 = vpop.f32.mrb[5].mxu0 }
 0x144   : > { %872 = vrot.lane.b32.xlu1 %v526_v14, %s1600_s19  ;;  %874 = vrot.lane.b32.xlu0 %v527_v8, %s1600_s19  ;;  %v523_v37 = vpop.f32.mrb[6].mxu0 }
 0x145   : > { %1288 = vmatmul.mubr.msk.bf16.vlgmr.msra.gmra.mrb[4].mxu1 %vm529_vm2, %v526_v14  ;;  %v1284_v38 = vpop.f32.mrb[7].mxu0  ;;  %v594_v39 = vsel %vm592_vm4, %v528_v35, 0 }
 0x146   : > { %1299 = vmatprep.mubr.msk.bf16.mxu1 %vm1597_vm0, %v1596_v0  ;;  %1292 = vmatpush3.bf16.msra.mxu0 %v594_v39  ;;  %v1426_v38 = vld [vmem:[%s1984_s5] sm:$0xff]   ;;  %v1427_v39 = vld [vmem:[%s1984_s5 + $0x8] sm:$0xff]  }
 0x147   : > { %1303 = vmatprep.subr.bf16.mxu0 %v1596_v0 }
 0x1ae   : > { %v642_v20 = vpop.permute.xlu0 %641  ;;  %v759_v22 = vpop.permute.xlu1 %758 }
 0x1af   : > { %v647_v21 = vsel %vm529_vm2, %v642_v20, 0  ;;  %v764_v24 = vsel %vm529_vm2, %v759_v22, 0 }
 0x1b0   : > { %1298 = vmatpush3.bf16.xpose.msra.mxu1 %v647_v21 }
 0x1b1   : > { %1309 = vmatprep.subr.bf16.mxu1 %v1596_v0 }
 0x1b2   : > { %v639_v23 = vpop.permute.xlu0 %638  ;;  %v757_v26 = vpop.permute.xlu1 %756 }
 0x1b6   : > { %v875_v25 = vpop.permute.xlu0 %874  ;;  %v873_v28 = vpop.permute.xlu1 %872 }
 0x1b7   : > { %1300 = vmatmul.mubr.msk.bf16.vlgmr.msra.gmra.mrb[8].mxu1 %vm529_vm2, %v639_v23  ;;  %v880_v27 = vsel %vm529_vm2, %v875_v25, 0 }
 0x1b8   : > { %1310 = vmatpush3.bf16.xpose.msra.mxu1 %v764_v24  ;;  %1311 = vmatprep.mubr.msk.bf16.mxu1 %vm1597_vm0, %v1596_v0 }
 0x1b9   : > { %1321 = vmatprep.subr.bf16.mxu1 %v1596_v0 }
 0x1bf   : > { %1312 = vmatmul.mubr.msk.bf16.vlgmr.msra.gmra.mrb[12].mxu1 %vm529_vm2, %v757_v26 }
 0x1c0   : > { %1322 = vmatpush3.bf16.xpose.msra.mxu1 %v880_v27  ;;  %1323 = vmatprep.mubr.msk.bf16.mxu1 %vm1597_vm0, %v1596_v0 }
 0x1c1   : > { %1333 = vmatprep.subr.bf16.mxu1 %v1596_v0 }
 0x1c7   : > { %1324 = vmatmul.mubr.msk.bf16.vlgmr.msra.gmra.mrb[16].mxu1 %vm529_vm2, %v873_v28 }
 0x1c8   : > { %1341 = vmatprep.mubr.msk.bf16.mxu1 %vm1597_vm0, %v1596_v0  ;;  %1334 = vmatpush3.bf16.msra.mxu1 %v1426_v38 }
 0x1c9   : > { %1335 = vmatprep.subr.bf16.mxu1 %v1596_v0 }
 0x1cc   : > { %1336 = vmatpush3.bf16.msra.mxu1 %v1427_v39 }
 0x1cd   : > { %1337 = vmatprep.subr.bf16.mxu1 %v1596_v0 }
 0x218   : > { %v570_v29 = vpop.f32.mrb[4].mxu1 }
 0x219   : > { %v1289_v30 = vpop.f32.mrb[5].mxu1  ;;  %v577_v31 = vsel %vm576_vm3, %v570_v29, -inf }
 0x21a   : > { %578 = vmax.xlane.f32.xlu0 %v577_v31  ;;  %v573_v32 = vpop.f32.mrb[6].mxu1 }
 0x21b   : > { %v1290_v33 = vpop.f32.mrb[7].mxu1 }
 0x28a   : > { %v683_v40 = vpop.f32.mrb[8].mxu1 }
 0x28b   : > { %v1301_v41 = vpop.f32.mrb[9].mxu1  ;;  %v689_v42 = vsel %vm576_vm3, %v683_v40, -inf }
 0x28c   : > { %690 = vmax.xlane.f32.xlu1 %v689_v42  ;;  %v686_v43 = vpop.f32.mrb[10].mxu1 }
 0x28d   : > { %v1302_v44 = vpop.f32.mrb[11].mxu1 }
 0x28e   : > { %v1428_v44 = vld [vmem:[%s1984_s5 + $0x10] sm:$0xff]  }
 0x28f   : > { %1338 = vmatpush3.bf16.msra.mxu1 %v1428_v44 }
 0x290   : > { %1339 = vmatprep.subr.bf16.mxu1 %v1596_v0 }
 0x292   : > { %v800_v45 = vpop.f32.mrb[12].mxu1 }
 0x293   : > { %v1313_v46 = vpop.f32.mrb[13].mxu1  ;;  %v806_v47 = vsel %vm576_vm3, %v800_v45, -inf }
 0x294   : > { %807 = vmax.xlane.f32.xlu0 %v806_v47  ;;  %v803_v48 = vpop.f32.mrb[14].mxu1 }
 0x295   : > { %v1314_v49 = vpop.f32.mrb[15].mxu1 }
 0x29a   : > { %v916_v50 = vpop.f32.mrb[16].mxu1 }
 0x29b   : > { %v1325_v51 = vpop.f32.mrb[17].mxu1  ;;  %v922_v52 = vsel %vm576_vm3, %v916_v50, -inf }
 0x29c   : > { %923 = vmax.xlane.f32.xlu0 %v922_v52  ;;  %v919_v53 = vpop.f32.mrb[18].mxu1 }
 0x29d   : > { %v1326_v54 = vpop.f32.mrb[19].mxu1 }
 0x2a7   : > { %v579_v55 = vpop.xlane.xlu0 %578 }
 0x2a8   : > { %v580_v56 = vsub.f32 %v570_v29, %v579_v55 }
 0x2aa   : > { %v581_v57 = vmul.f32 1.442695, %v580_v56 }
 0x2ac   : > { %1430 = vpow2.f32 %v581_v57 }
 0x2b6   : > { %v1431_v58 = vpop.eup %1430 }
 0x2b7   : > { %v583_v59 = vsel %vm576_vm3, %v1431_v58, 0.0 }
 0x2b8   : > { %584 = vadd.xlane.f32.xlu1 %v583_v59 }
 0x2c9   : > { %702 = vrot.lane.b32.xlu1 %v528_v35, %s1599_s10 }
 0x319   : > { %v691_v60 = vpop.xlane.xlu1 %690 }
 0x31a   : > { %v692_v61 = vsub.f32 %v683_v40, %v691_v60 }
 0x31c   : > { %v693_v62 = vmul.f32 1.442695, %v692_v61 }
 0x31e   : > { %1432 = vpow2.f32 %v693_v62 }
 0x321   : > { %v808_v63 = vpop.xlane.xlu0 %807 }
 0x322   : > { %v809_v1 = vsub.f32 %v800_v45, %v808_v63  ;;  %v1429_v45 = vld [vmem:[%s1984_s5 + $0x18] sm:$0xff]  }
 0x323   : > { %1340 = vmatpush3.bf16.msra.mxu1 %v1429_v45 }
 0x324   : > { %v810_v2 = vmul.f32 1.442695, %v809_v1 }
 0x326   : > { %1434 = vpow2.f32 %v810_v2 }
 0x328   : > { %v1433_v3 = vpop.eup %1432 }
 0x329   : > { %v924_v4 = vpop.xlane.xlu0 %923  ;;  %v695_v5 = vsel %vm576_vm3, %v1433_v3, 0.0 }
 0x32a   : > { %v925_v6 = vsub.f32 %v916_v50, %v924_v4  ;;  %696 = vadd.xlane.f32.xlu0 %v695_v5 }
 0x32c   : > { %v926_v7 = vmul.f32 1.442695, %v925_v6 }
 0x32e   : > { %1436 = vpow2.f32 %v926_v7 }
 0x330   : > { %v1435_v8 = vpop.eup %1434 }
 0x331   : > { %v812_v9 = vsel %vm576_vm3, %v1435_v8, 0.0 }
 0x332   : > { %813 = vadd.xlane.f32.xlu1 %v812_v9 }
 0x338   : > { %v1437_v10 = vpop.eup %1436 }
 0x339   : > { %v928_v11 = vsel %vm576_vm3, %v1437_v10, 0.0 }
 0x33a   : > { %929 = vadd.xlane.f32.xlu0 %v928_v11 }
 0x343   : > { %934 = vrot.lane.b32.xlu1 %v528_v35, %s1600_s19  ;;  %s1602_s19 = smov 32  }
 0x345   : > { %v585_v12 = vpop.xlane.xlu1 %584 }
 0x346   : > { %1438 = vrcp.f32 %v585_v12 }
 0x349   : > { %v703_v14 = vpop.permute.xlu1 %702 }
 0x34a   : > { %v708_v17 = vsel %vm592_vm4, %v703_v14, 0 }
 0x350   : > { %v1439_v13 = vpop.eup %1438  ;;  %818 = vrot.lane.b32.xlu0 %v528_v35, %s1598_s18  ;;  %s1604_s18 = smov [#allocation8]  }
 0x351   : > { %v587_v15 = vmul.f32 %v1439_v13, %v1431_v58  ;;  %v1221_v58 = vld [vmem:[%s1985_s6] ss:$0 sm:$0xff]  ;;  %s1510_s10 = sshll.u32 %s1604_s18, 4  ;;  %s1511_s10 = int_to_ptr.vmem [resolvable:$false] %s1510_s10 }
 0x352   : > { %p1513_p10 = scmp.lt.s32.totalorder %s1931_s23, %s1511_s10 }
 0x353   : > { %v588_v16 = vpack.c.bf16 %v587_v15, %v587_v15 }
 0x355   : > { %1294 = vmatmul.mubr.msk.bf16.vlgmr.msra.gmra.mrb[8].mxu0 %vm576_vm3, %v588_v16 }
 0x356   : > { %1304 = vmatpush3.bf16.msra.mxu0 %v708_v17  ;;  %1305 = vmatprep.mubr.msk.bf16.mxu0 %vm1597_vm0, %v1596_v0 }
 0x357   : > { %1315 = vmatprep.subr.bf16.mxu0 %v1596_v0 }
 0x3b7   : > { %v697_v18 = vpop.xlane.xlu0 %696 }
 0x3b8   : > { %1440 = vrcp.f32 %v697_v18 }
 0x3bf   : > { %v814_v19 = vpop.xlane.xlu1 %813 }
 0x3c0   : > { %1442 = vrcp.f32 %v814_v19 }
 0x3c2   : > { %v1441_v20 = vpop.eup %1440 }
 0x3c3   : > { %v699_v21 = vmul.f32 %v1441_v20, %v1433_v3  ;;  %v935_v28 = vpop.permute.xlu1 %934 }
 0x3c4   : > { %v940_v30 = vsel %vm592_vm4, %v935_v28, 0 }
 0x3c5   : > { %v700_v22 = vpack.c.bf16 %v699_v21, %v699_v21 }
 0x3c7   : > { %v930_v23 = vpop.xlane.xlu0 %929  ;;  %1306 = vmatmul.mubr.msk.bf16.vlgmr.msra.gmra.mrb[12].mxu0 %vm576_vm3, %v700_v22 }
 0x3c8   : > { %1444 = vrcp.f32 %v930_v23  ;;  %1317 = vmatprep.mubr.msk.bf16.mxu0 %vm1597_vm0, %v1596_v0 }
 0x3ca   : > { %v1443_v24 = vpop.eup %1442 }
 0x3cb   : > { %v816_v25 = vmul.f32 %v1443_v24, %v1435_v8  ;;  %v819_v26 = vpop.permute.xlu0 %818 }
 0x3cc   : > { %v824_v27 = vsel %vm592_vm4, %v819_v26, 0 }
 0x3cd   : > { %1316 = vmatpush3.bf16.msra.mxu0 %v824_v27  ;;  %v817_v29 = vpack.c.bf16 %v816_v25, %v816_v25 }
 0x3ce   : > { %1327 = vmatprep.subr.bf16.mxu0 %v1596_v0 }
 0x3d0   : > { %1318 = vmatmul.mubr.msk.bf16.vlgmr.msra.gmra.mrb[16].mxu0 %vm576_vm3, %v817_v29 }
 0x3d1   : > { %1328 = vmatpush3.bf16.msra.mxu0 %v940_v30  ;;  %1329 = vmatprep.mubr.msk.bf16.mxu0 %vm1597_vm0, %v1596_v0 }
 0x3d2   : > { %v1445_v31 = vpop.eup %1444 }
 0x3d3   : > { %v932_v32 = vmul.f32 %v1445_v31, %v1437_v10 }
 0x3d5   : > { %v933_v33 = vpack.c.bf16 %v932_v32, %v932_v32 }
 0x3d8   : > { %1330 = vmatmul.mubr.msk.bf16.vlgmr.msra.gmra.mrb[20].mxu0 %vm576_vm3, %v933_v33 }
 0x428   : > { %v630_v34 = vpop.f32.mrb[8].mxu0 }
 0x429   : > { %636 = vst.msk [vmem:[#allocation2] sm:$0xff] %vm529_vm2, %v630_v34  ;;  %v1295_v35 = vpop.f32.mrb[9].mxu0 }
 0x42a   : > { %v633_v36 = vpop.f32.mrb[10].mxu0 }
 0x42b   : > { %v1296_v37 = vpop.f32.mrb[11].mxu0 }
 0x49a   : > { %v744_v40 = vpop.f32.mrb[12].mxu0 }
 0x49b   : > { %751 = vrot.lane.b32.xlu1 %v744_v40, %s1601_s17  ;;  %v1307_v41 = vpop.f32.mrb[13].mxu0 }
 0x49c   : > { %v747_v42 = vpop.f32.mrb[14].mxu0 }
 0x49d   : > { %v1308_v43 = vpop.f32.mrb[15].mxu0 }
 0x4a3   : > { %v860_v46 = vpop.f32.mrb[16].mxu0 }
 0x4a4   : > { %867 = vrot.lane.b32.xlu0 %v860_v46, %s1602_s19  ;;  %v1319_v47 = vpop.f32.mrb[17].mxu0  ;;  %s1512_s19 = scalar_lea.vmem %s1511_s10, 256 }
 0x4a5   : > { %v863_v48 = vpop.f32.mrb[18].mxu0  ;;  %p1514_p12 = scmp.lt.s32.totalorder %s1512_s19, %s1506_s9 }
 0x4a6   : > { %v1320_v49 = vpop.f32.mrb[19].mxu0 }
 0x4a7   : > { %p1515_p1 = por %p1514_p12, %p1513_p10 }
 0x4a9   : > { %p1516_p2 = pnand %p1515_p1, %p1509_p4 }
 0x4ab   : > { %v976_v50 = vpop.f32.mrb[20].mxu0 }
 0x4ac   : > { %983 = vrot.lane.b32.xlu1 %v976_v50, %s1603_s11  ;;  %v1331_v51 = vpop.f32.mrb[21].mxu0 }
 0x4ad   : > { %v979_v52 = vpop.f32.mrb[22].mxu0 }
 0x4ae   : > { %v1332_v53 = vpop.f32.mrb[23].mxu0 }
 0x50d   : > { %v752_v54 = vpop.permute.xlu1 %751 }
 0x50e   : > { %755 = vst.msk [vmem:[#allocation2] sm:$0xff] %vm754_vm5, %v752_v54 }
 0x516   : > { %v868_v0 = vpop.permute.xlu0 %867 }
 0x517   : > { %871 = vst.msk [vmem:[#allocation2] sm:$0xff] %vm870_vm6, %v868_v0 }
 0x51e   : > { %v984_v55 = vpop.permute.xlu1 %983 }
 0x51f   : > { %987 = vst.msk [vmem:[#allocation2] sm:$0xff] %vm986_vm7, %v984_v55 }
 0x526   : > { %v988_v56 = vld [vmem:[#allocation2] sm:$0xff] }
 0x527   : > { %v989_v57 = vpack.c.bf16 %v988_v56, %v988_v56 }
 0x529   : > { %1342 = vmatmul.mubr.msk.bf16.vlgmr.msra.gmra.mrb[20].mxu1 %vm1029_vm8, %v989_v57 }
 0x5fc   : > { %v1067_v59 = vpop.f32.mrb[20].mxu1 }
 0x5fd   : > { %v1068_v60 = vadd.f32 %v1221_v58, %v1067_v59  ;;  %v1343_v61 = vpop.f32.mrb[21].mxu1 }
 0x5fe   : > { %v1070_v62 = vpop.f32.mrb[22].mxu1 }
 0x5ff   : > { %v1344_v63 = vpop.f32.mrb[23].mxu1  ;;  %1073 = vst.msk [vmem:[%s347_s22] sm:$0xff] %vm367_vm1, %v1068_v60 }
 0x600   : > { %1519 = shalt.err (!%p1516_p2)
}
 0x601   : > { %s1520_s30 = scalar_lea.hbm %s1929_s21, 128  ;;  %s1524_s8 = scalar_lea.hbm %s1986_s7, 256 }
 0x602   : > { %p1521_p9 = scmp.ne.s32.totalorder %s1929_s21, %s1520_s30  ;;  %p1525_p6 = scmp.lt.u32.totalorder %s1929_s21, %s1986_s7 }
 0x603   : > { %p1526_p13 = scmp.lt.u32.totalorder %s1524_s8, %s1520_s30  ;;  %p1528_p8 = scmp.lt.u32.totalorder %s1520_s30, %s1929_s21 }
 0x604   : > { %p1522_p11 = pnand %p1521_p9, %p2007_p0 }
 0x605   : > { %p1527_p5 = por %p1526_p13, %p1525_p6 }
 0x606   : > { %p1523_p3 = pneg %p1522_p11 }
 0x607   : > { %p1529_p7 = por %p1528_p8, %p1527_p5 }
 0x609   : > { %p1530_p4 = pnand %p1529_p7, %p1523_p3 }
 0x60b   : > { %1533 = shalt.err (!%p1530_p4)
}
 0x60c   : > { %1349 = dma.vmem_to_hbm [thread:$0]  (%p2007_p0), %s1931_s23, 128, %s1929_s21, %s1075_s27  }
 0x60d PF: > { %s1101_s22 = sand.u32 1, %s1572_s24   ;;  %p2008_p10 = scmp.ne.s32.totalorder %s1997_s16, 0 }
 0x60e   : > { %p2009_p12 = scmp.ge.s32.totalorder %s1592_s29, 2  ;;  %s1102_s13 = scalar_lea.sflag [#allocation5], %s1101_s22 }
 0x610   : > { %p1359_p1 = pnand %p2009_p12, %p2008_p10 }
 0x612   : > { %1567 = dma.done.wait (!%p1359_p1), %s1102_s13, 128  }
 0x613   : > { %1569 = vsyncadd (!%p1359_p1), %s1102_s13, 4294967168  ;;  %s26_s29 = sadd.s32 1, %s1592_s29   ;;  %s2010_s14 = sld [smem:[#allocation12_spill]] }
 0x614   : > { %p23_p2 = scmp.ge.s32.totalorder %s26_s29, 4   ;;  %s2011_s24 = smov %s1576_s25 }
 0x615   : > { %s2012_s25 = smov %s1580_s26  ;;  %s2013_s26 = smov %s1701_s15 }
 0x616   : > { %s2014_s27 = smov %s1588_s28  ;;  %25 = sbr.rel (!%p23_p2) target bundleno = 10 (0xa), region = 106 }
 0x619   : > { %s2015_s28 = smov %s2010_s14 }
 0x61d   :  { %1107 = vsyncpa [#allocation4], 1 }
 0x61e   :  { %1109 = vsyncpa [#allocation4 + $0x1], 1 }
 0x61f   :  { %1110 = vsyncpa [#allocation7], 1 }
 0x620   :  { %1112 = vsyncpa [#allocation7 + $0x1], 1 }
 0x621   :  { %1113 = vsyncpa [#allocation5], 1 }
 0x622   :  { %1115 = vsyncpa [#allocation5 + $0x1], 1 }

</bundles_post_ra>
